<compile_context>
chip_gen: v7x
topology: tpu7x:2x2x1
jax: 0.10.0
libtpu: 0.0.40
codegen_flags: <defaults>
</compile_context>

<pallas_src>
import functools

import jax
import jax.numpy as jnp
from jax.experimental import pallas as pl
from jax.experimental.pallas import tpu as pltpu


def _round_up(v, m):
    return ((v + m - 1) // m) * m


def _sublane(dtype):
    """Minimum sublane multiple for the second-to-last dim, per dtype width."""
    itemsize = jnp.dtype(dtype).itemsize
    if itemsize >= 4:
        return 8
    if itemsize == 2:
        return 16
    return 32


def _linear_kernel(x_ref, w_ref, b_ref, o_ref, acc_ref, *, precision):
    # x_ref: (tm, tk), w_ref: (tk, tn) [W pre-transposed], b_ref: (1, tn),
    # o_ref: (tm, tn), acc_ref: f32 (tm, tn) scratch.
    k = pl.program_id(2)

    @pl.when(k == 0)
    def _():
        # Seed the accumulator with the broadcast bias: removes a VPU add
        # from the epilogue of every (i, j) output tile.
        acc_ref[...] = jnp.broadcast_to(
            b_ref[...].astype(jnp.float32), acc_ref.shape)

    acc_ref[...] += jnp.dot(
        x_ref[...], w_ref[...],
        preferred_element_type=jnp.float32,
        precision=precision,
    )

    @pl.when(k == pl.num_programs(2) - 1)
    def _():
        o_ref[...] = acc_ref[...].astype(o_ref.dtype)


def prepare_linear_params(weight, bias, *, tile_n=512, tile_k=1024):
    """One-time (parameter-init time) preparation.

    Transposes W -> (K, N) (lane-dense along N) and zero-pads W / bias to
    tile multiples so the per-forward hot path never re-materializes the
    weight in HBM.
    """
    N, K = weight.shape
    tn = min(tile_n, _round_up(N, 128))
    tk = min(tile_k, _round_up(K, 128))
    Np, Kp = _round_up(N, tn), _round_up(K, tk)

    w_t = weight.T  # (K, N)
    if (Kp, Np) != (K, N):
        w_t = jnp.pad(w_t, ((0, Kp - K), (0, Np - N)))
    b_p = bias.reshape(1, N)
    if Np != N:
        b_p = jnp.pad(b_p, ((0, 0), (0, Np - N)))

    return {"w_t": w_t, "b": b_p, "N": N, "K": K, "tn": tn, "tk": tk}


def linear_pallas(x, prepared, *, tile_m=512):
    """y = x @ weight.T + bias (torch.nn.Linear semantics).

    `prepared` comes from prepare_linear_params(weight, bias).
    """
    # TODO(synk): dropout (p > 0, training mode) not implemented; the module's
    # default p=0.0 path (identity) is what this kernel computes.
    w_t, b_p = prepared["w_t"], prepared["b"]
    N, K = prepared["N"], prepared["K"]
    tn, tk = prepared["tn"], prepared["tk"]
    Kp, Np = w_t.shape

    orig_shape = x.shape
    assert orig_shape[-1] == K, "last dim of x must equal in_features"
    x2d = x.reshape(-1, K)
    M = x2d.shape[0]

    # Dtype-aware sublane rounding for the M axis.
    sub = _sublane(x.dtype)
    if M <= tile_m:
        # Single M block: W is streamed from HBM exactly once (decode case).
        tm = _round_up(M, sub)
    else:
        tm = _round_up(tile_m, sub)
    Mp = _round_up(M, tm)

    # v7x has 2 TensorCores; megacore sharding needs >=2 blocks on a
    # "parallel" axis.  If M collapsed to one block, split N when possible
    # (Np is already a multiple of tn, so Np//2 stays a multiple of 128
    # whenever Np % 256 == 0).
    if Mp // tm == 1 and Np // tn == 1 and Np % 256 == 0:
        tn = Np // 2

    # Pad x only when needed (pad is a full HBM pass, not a view).
    if (Mp, Kp) != (M, K):
        x2d = jnp.pad(x2d, ((0, Mp - M), (0, Kp - K)))

    grid = (Mp // tm, Np // tn, Kp // tk)

    # Explicit matmul precision: f32 inputs -> HIGHEST (matches the PyTorch
    # f32 reference); bf16/others -> native MXU path.
    precision = (jax.lax.Precision.HIGHEST
                 if x.dtype == jnp.float32 else jax.lax.Precision.DEFAULT)
    kernel = functools.partial(_linear_kernel, precision=precision)

    # Accurate VMEM estimate: double-buffered x / W^T / bias / out tiles plus
    # the f32 accumulator; ~50% headroom; generation-aware cap.
    x_bytes = x2d.dtype.itemsize
    w_bytes = w_t.dtype.itemsize
    o_bytes = jnp.dtype(x.dtype).itemsize
    est = (2 * (tm * tk * x_bytes + tk * tn * w_bytes + tn * w_bytes
                + tm * tn * o_bytes)
           + tm * tn * 4)
    try:
        phys_vmem = pltpu.get_tpu_info().vmem_capacity_bytes
    except Exception:
        phys_vmem = 64 << 20          # conservative: v7x per-TC VMEM
    cap = (3 * phys_vmem) // 4        # headroom for compiler internal scratch
    vmem_limit = int(min(max(int(est * 1.5), 32 << 20), cap))

    cost = pl.CostEstimate(
        flops=2 * M * N * K,
        bytes_accessed=(x2d.size * x_bytes + w_t.size * w_bytes
                        + b_p.size * b_p.dtype.itemsize + Mp * Np * o_bytes),
        transcendentals=0,
    )

    out = pl.pallas_call(
        kernel,
        out_shape=jax.ShapeDtypeStruct((Mp, Np), x.dtype),
        grid_spec=pltpu.PrefetchScalarGridSpec(
            num_scalar_prefetch=0,
            grid=grid,
            in_specs=[
                pl.BlockSpec((tm, tk), lambda i, j, k: (i, k)),   # x tile
                pl.BlockSpec((tk, tn), lambda i, j, k: (k, j)),   # W^T tile
                pl.BlockSpec((1, tn), lambda i, j, k: (0, j)),    # bias tile
            ],
            out_specs=pl.BlockSpec((tm, tn), lambda i, j, k: (i, j)),
            scratch_shapes=[pltpu.VMEM((tm, tn), jnp.float32)],
        ),
        compiler_params=pltpu.CompilerParams(
            dimension_semantics=("parallel", "parallel", "arbitrary"),
            vmem_limit_bytes=vmem_limit,
        ),
        cost_estimate=cost,
    )(x2d, w_t, b_p)

    # Slice only when padding was introduced.
    if (Mp, Np) != (M, N):
        out = out[:M, :N]
    return out.reshape(*orig_shape[:-1], N)


def init_linear_params(key, in_features, out_features, dtype=jnp.float32):
    """Matches the module's reset_params():
       kaiming_normal_(weight) -> N(0, sqrt(2/fan_in)), bias = 0."""
    std = (2.0 / in_features) ** 0.5
    weight = std * jax.random.normal(key, (out_features, in_features), dtype=dtype)
    bias = jnp.zeros((out_features,), dtype=dtype)
    return weight, bias


if __name__ == "__main__":
    batch, seq, in_features, out_features = 2, 8, 32, 64

    key = jax.random.PRNGKey(0)
    k_x, k_w = jax.random.split(key)

    x = jax.random.normal(k_x, (batch, seq, in_features), dtype=jnp.float32)
    weight, bias = init_linear_params(k_w, in_features, out_features)

    # Weight transpose/pad done once, outside the per-forward hot path.
    prepared = prepare_linear_params(weight, bias)

    y = linear_pallas(x, prepared)
    y = jax.block_until_ready(y)

    # Sanity check vs plain JAX reference.
    y_ref = x @ weight.T + bias
    assert y.shape == (batch, seq, out_features)
    assert jnp.allclose(y, y_ref, atol=1e-5, rtol=1e-5)

    print("KERNEL_OK")
</pallas_src>

<mosaic_0001>
module attributes {stable_mosaic.version = 11 : i64} {
  func.func @_linear_kernel(%arg0: i32, %arg1: i32, %arg2: i32, %arg3: memref<16x128xf32, #tpu.memory_space<vmem>>, %arg4: memref<128x128xf32, #tpu.memory_space<vmem>>, %arg5: memref<1x128xf32, #tpu.memory_space<vmem>>, %arg6: memref<16x128xf32, #tpu.memory_space<vmem>>, %arg7: memref<16x128xf32, #tpu.memory_space<vmem>>) attributes {dimension_semantics = [#tpu.dimension_semantics<parallel>, #tpu.dimension_semantics<parallel>, #tpu.dimension_semantics<arbitrary>], iteration_bounds = array<i64: 1, 1, 1>, scalar_prefetch = 0 : i64, scratch_operands = 1 : i64, tpu.core_type = #tpu.core_type<tc>, window_params = [{transform_indices = @transform_0, window_bounds = array<i64: 16, 128>}, {transform_indices = @transform_1, window_bounds = array<i64: 128, 128>}, {transform_indices = @transform_2, window_bounds = array<i64: 1, 128>}, {transform_indices = @transform_3, window_bounds = array<i64: 16, 128>}]} {
    %c0_i32 = arith.constant 0 : i32
    %0 = arith.cmpi eq, %arg2, %c0_i32 : i32
    %1 = arith.extui %0 : i1 to i32
    %c0_i32_0 = arith.constant 0 : i32
    %2 = arith.cmpi ne, %1, %c0_i32_0 : i32
    scf.if %2 {
      %c0_10 = arith.constant 0 : index
      %c0_11 = arith.constant 0 : index
      %12 = vector.load %arg5[%c0_10, %c0_11] : memref<1x128xf32, #tpu.memory_space<vmem>>, vector<1x128xf32>
      %13 = vector.shape_cast %12 : vector<1x128xf32> to vector<1x128xf32>
      %14 = vector.broadcast %13 : vector<1x128xf32> to vector<16x128xf32>
      %c0_12 = arith.constant 0 : index
      %c0_13 = arith.constant 0 : index
      %15 = vector.load %arg7[%c0_12, %c0_13] : memref<16x128xf32, #tpu.memory_space<vmem>>, vector<16x128xf32>
      tpu.vector_store %arg7[%c0_12, %c0_13], %14 {strides = array<i32>} : memref<16x128xf32, #tpu.memory_space<vmem>>, vector<16x128xf32>,
    } else {
    }
    %c0 = arith.constant 0 : index
    %c0_1 = arith.constant 0 : index
    %3 = vector.load %arg7[%c0, %c0_1] : memref<16x128xf32, #tpu.memory_space<vmem>>, vector<16x128xf32>
    %c0_2 = arith.constant 0 : index
    %c0_3 = arith.constant 0 : index
    %4 = vector.load %arg3[%c0_2, %c0_3] : memref<16x128xf32, #tpu.memory_space<vmem>>, vector<16x128xf32>
    %c0_4 = arith.constant 0 : index
    %c0_5 = arith.constant 0 : index
    %5 = vector.load %arg4[%c0_4, %c0_5] : memref<128x128xf32, #tpu.memory_space<vmem>>, vector<128x128xf32>
    %cst = arith.constant dense<0.000000e+00> : vector<16x128xf32>
    %6 = tpu.matmul %4, %5, %cst {dimension_numbers = #tpu.dot_dimension_numbers<[1], [0], [0], [1], [0, 0, 1, 1], [], []>, precision = #tpu.contract_precision<fp32>} : vector<16x128xf32>, vector<128x128xf32>, vector<16x128xf32> -> vector<16x128xf32>
    %7 = arith.addf %3, %6 : vector<16x128xf32>
    %c0_6 = arith.constant 0 : index
    %c0_7 = arith.constant 0 : index
    %8 = vector.load %arg7[%c0_6, %c0_7] : memref<16x128xf32, #tpu.memory_space<vmem>>, vector<16x128xf32>
    tpu.vector_store %arg7[%c0_6, %c0_7], %7 {strides = array<i32>} : memref<16x128xf32, #tpu.memory_space<vmem>>, vector<16x128xf32>,
    %c0_i32_8 = arith.constant 0 : i32
    %9 = arith.cmpi eq, %arg2, %c0_i32_8 : i32
    %10 = arith.extui %9 : i1 to i32
    %c0_i32_9 = arith.constant 0 : i32
    %11 = arith.cmpi ne, %10, %c0_i32_9 : i32
    scf.if %11 {
      %c0_10 = arith.constant 0 : index
      %c0_11 = arith.constant 0 : index
      %12 = vector.load %arg7[%c0_10, %c0_11] : memref<16x128xf32, #tpu.memory_space<vmem>>, vector<16x128xf32>
      %c0_12 = arith.constant 0 : index
      %c0_13 = arith.constant 0 : index
      %13 = vector.load %arg6[%c0_12, %c0_13] : memref<16x128xf32, #tpu.memory_space<vmem>>, vector<16x128xf32>
      tpu.vector_store %arg6[%c0_12, %c0_13], %12 {strides = array<i32>} : memref<16x128xf32, #tpu.memory_space<vmem>>, vector<16x128xf32>,
    } else {
    }
    return
  }
  func.func @transform_0(%arg0: i32, %arg1: i32, %arg2: i32) -> (i32, i32) {
    %c0_i32 = arith.constant 0 : i32
    return %arg0, %arg2 : i32, i32
  }
  func.func @transform_1(%arg0: i32, %arg1: i32, %arg2: i32) -> (i32, i32) {
    %c0_i32 = arith.constant 0 : i32
    return %arg2, %arg1 : i32, i32
  }
  func.func @transform_2(%arg0: i32, %arg1: i32, %arg2: i32) -> (i32, i32) {
    %c0_i32 = arith.constant 0 : i32
    %c0_i32_0 = arith.constant 0 : i32
    return %c0_i32, %arg1 : i32, i32
  }
  func.func @transform_3(%arg0: i32, %arg1: i32, %arg2: i32) -> (i32, i32) {
    %c0_i32 = arith.constant 0 : i32
    return %arg0, %arg1 : i32, i32
  }
}

</mosaic_0001>

<bundles_post_ra>
// kernel: tpu_custom_call.1
= control target key start
LH: loop header
LB: loop body
LE: loop exit
PB: predicated region body
PF: predicated region fallthrough
CT: control target
= control target key end

     0   :  { %8 = vsyncpa [#allocation4], 0  ;;  %s1726_s0 = inlined_call_operand.hbm [shape: f32[16,128], index: 0, kind: input, shape index: {}]   ;;  %s1727_s1 = inlined_call_operand.hbm [shape: f32[128,128], index: 1, kind: input, shape index: {}]   ;;  %s1728_s2 = inlined_call_operand.vmem [shape: f32[1,128], index: 2, kind: input, shape index: {}]   ;;  %s1729_s3 = inlined_call_operand.hbm [shape: f32[16,128], index: 3, kind: output, shape index: {}]  }
   0x1   :  { %9 = vsyncpa [#allocation7], 0 }
   0x2   :  { %10 = vsyncpa [#allocation5], 0  ;;  %s1387_s12 = smov [#allocation3]   ;;  %s1315_s16 = scalar_lea.hbm %s1726_s0, 256 }
   0x3   :  { %s16_s13 = sshll.u32 %s1387_s12, 4  ;;  %p1316_p0 = scmp.ne.s32.totalorder %s1726_s0, %s1315_s16  ;;  %s17_s13 = int_to_ptr.vmem [resolvable:$true] %s16_s13 }
   0x4   :  { %p1319_p1 = scmp.lt.u32.totalorder %s1315_s16, %s1726_s0 }
   0x6   :  { %p1321_p2 = pnand %p1319_p1, %p1316_p0 }
   0x8   :  { %1324 = shalt.err (!%p1321_p2)
}
   0x9   :  { %s1325_s21 = scalar_lea.vmem %s17_s13, 256  ;;  %p1330_p4 = scmp.lt.s32.totalorder %s17_s13, %s17_s13 }
   0xa   :  { %p1326_p3 = scmp.ne.s32.totalorder %s17_s13, %s1325_s21  ;;  %p1331_p5 = scmp.lt.s32.totalorder %s1325_s21, %s1325_s21 }
   0xc   :  { %p1332_p6 = por %p1331_p5, %p1330_p4 }
   0xe   :  { %p1333_p7 = pnand %p1332_p6, %p1326_p3 }
  0x10   :  { %1336 = shalt.err (!%p1333_p7)
}
  0x11   :  { %s1388_s22 = smov 128   ;;  %s1389_s23 = smov 8  }
  0x12   :  { %22 = dma.hbm_to_vmem [thread:$0]  %s1726_s0, 256, %s17_s13, [#allocation4], %s1388_s22, %s1388_s22, %s1389_s23  }
  0x13   :  { %s1390_s26 = smov [#allocation6]   ;;  %s1337_s30 = scalar_lea.hbm %s1727_s1, 2048 }
  0x14   :  { %s28_s27 = sshll.u32 %s1390_s26, 4  ;;  %p1338_p8 = scmp.ne.s32.totalorder %s1727_s1, %s1337_s30  ;;  %s29_s27 = int_to_ptr.vmem [resolvable:$true] %s28_s27 }
  0x15   :  { %p1341_p9 = scmp.lt.u32.totalorder %s1337_s30, %s1727_s1 }
  0x17   :  { %p1343_p10 = pnand %p1341_p9, %p1338_p8 }
  0x19   :  { %1346 = shalt.err (!%p1343_p10)
}
  0x1a   :  { %s1347_s8 = scalar_lea.vmem %s29_s27, 2048  ;;  %p1352_p12 = scmp.lt.s32.totalorder %s29_s27, %s29_s27 }
  0x1b   :  { %p1348_p11 = scmp.ne.s32.totalorder %s29_s27, %s1347_s8  ;;  %p1353_p13 = scmp.lt.s32.totalorder %s1347_s8, %s1347_s8 }
  0x1d   :  { %p1354_p0 = por %p1353_p13, %p1352_p12 }
  0x1f   :  { %p1355_p1 = pnand %p1354_p0, %p1348_p11 }
  0x21   :  { %1358 = shalt.err (!%p1355_p1)
}
  0x22   :  { %34 = dma.hbm_to_vmem [thread:$0]  %s1727_s1, 2048, %s29_s27, [#allocation7], %s1388_s22, %s1388_s22, %s1389_s23  }
  0x23   :  { %1381 = dma.done.wait [#allocation4], 256  }
  0x24   :  { %1382 = vsyncadd [#allocation4], 4294967040 }
  0x25   :  { %1383 = dma.done.wait [#allocation7], 2048  }
  0x26   :  { %1384 = vsyncadd [#allocation7], 4294965248  ;;  %v60_v0 = vld [vmem:[#allocation6] sm:$0xff]  ;;  %v61_v1 = vld [vmem:[#allocation6 + $0x8] sm:$0xff]  ;;  %s1391_s11 = smov [#allocation8]  }
  0x27   :  { %v62_v2 = vld [vmem:[#allocation6 + $0x10] sm:$0xff]  ;;  %v77_v3 = vand.u32 4294901760, %v60_v0  ;;  %v80_v4 = vand.u32 4294901760, %v61_v1  ;;  %v1442_v5 = vld [vmem:[#allocation6 + $0x18] sm:$0xff]  ;;  %v1444_v7 = vld [vmem:[#allocation6 + $0x20] sm:$0xff]  ;;  %s776_s12 = sshll.u32 %s1391_s11, 4  ;;  %s777_s12 = int_to_ptr.vmem [resolvable:$true] %s776_s12 }
  0x28   :  { %v83_v6 = vand.u32 4294901760, %v62_v2  ;;  %v1446_v8 = vld [vmem:[#allocation6 + $0x28] sm:$0xff]  ;;  %v86_v9 = vand.u32 4294901760, %v1442_v5  ;;  %v89_v11 = vand.u32 4294901760, %v1444_v7  ;;  %v1455_v14 = vld [vmem:[#allocation6 + $0x30] sm:$0xff]  ;;  %v1457_v15 = vld [vmem:[#allocation6 + $0x38] sm:$0xff]  ;;  %p1364_p3 = scmp.lt.s32.totalorder %s777_s12, %s777_s12 }
  0x29   :  { %v1449_v10 = vpack.c.bf16 %v80_v4, %v77_v3  ;;  %v92_v12 = vand.u32 4294901760, %v1446_v8  ;;  %v58_v16 = vld [vmem:[#allocation3] sm:$0xff]  ;;  %v95_v19 = vand.u32 4294901760, %v1455_v14  ;;  %v98_v20 = vand.u32 4294901760, %v1457_v15  ;;  %v1475_v21 = vld [vmem:[#allocation6 + $0x40] sm:$0xff]  ;;  %v1477_v22 = vld [vmem:[#allocation6 + $0x48] sm:$0xff] }
  0x2a   :  { %v1453_v13 = vpack.c.bf16 %v86_v9, %v83_v6  ;;  %v1463_v17 = vand.u32 4294901760, %v58_v16  ;;  %v101_v26 = vand.u32 4294901760, %v1475_v21  ;;  %v104_v27 = vand.u32 4294901760, %v1477_v22  ;;  %v1495_v28 = vld [vmem:[#allocation6 + $0x50] sm:$0xff]  ;;  %v1497_v29 = vld [vmem:[#allocation6 + $0x58] sm:$0xff]  ;;  %v1512_v36 = vld [vmem:[#allocation6 + $0x60] sm:$0xff] }
  0x2b   :  { %1109 = vmatprep.subr.bf16.mxu1 %v1449_v10  ;;  %1205 = vmatprep.subr.bf16.mxu0 %v1449_v10  ;;  %v1471_v18 = vpack.c.bf16 %v92_v12, %v89_v11  ;;  %v1491_v25 = vpack.c.bf16 %v98_v20, %v95_v19  ;;  %v107_v31 = vand.u32 4294901760, %v1495_v28  ;;  %v59_v33 = vld [vmem:[#allocation3 + $0x8] sm:$0xff]  ;;  %v110_v35 = vand.u32 4294901760, %v1497_v29  ;;  %v1514_v37 = vld [vmem:[#allocation6 + $0x68] sm:$0xff]  ;;  %v1526_v43 = vld [vmem:[#allocation6 + $0x70] sm:$0xff]  ;;  %s1359_s13 = scalar_lea.vmem %s777_s12, 256 }
  0x2c   :  { %1111 = vmatpush3.bf16.msra.mxu1 %v1449_v10  ;;  %1207 = vmatpush3.bf16.msra.mxu0 %v1449_v10  ;;  %v1480_v23 = vsub.f32 %v58_v16, %v1463_v17  ;;  %v1509_v34 = vpack.c.bf16 %v104_v27, %v101_v26  ;;  %v1516_v38 = vsub.f32 %v60_v0, %v77_v3  ;;  %v1520_v40 = vand.u32 4294901760, %v59_v33  ;;  %v1528_v44 = vld [vmem:[#allocation6 + $0x78] sm:$0xff]  ;;  %p1360_p2 = scmp.ne.s32.totalorder %s777_s12, %s1359_s13  ;;  %p1365_p4 = scmp.lt.s32.totalorder %s1359_s13, %s1359_s13 }
  0x2d   :  { %1113 = vmatprep.subr.bf16.mxu1 %v1453_v13  ;;  %1209 = vmatprep.subr.bf16.mxu0 %v1453_v13  ;;  %v1518_v39 = vsub.f32 %v61_v1, %v80_v4  ;;  %v113_v41 = vand.u32 4294901760, %v1512_v36  ;;  %v116_v42 = vand.u32 4294901760, %v1514_v37  ;;  %v1530_v45 = vsub.f32 %v62_v2, %v83_v6 }
  0x2e   :  { %v159_v24 = vand.u32 4294901760, %v1480_v23  ;;  %v1538_v46 = vpack.c.bf16 %v110_v35, %v107_v31  ;;  %v180_v47 = vand.u32 4294901760, %v1516_v38  ;;  %v1543_v49 = vsub.f32 %v1442_v5, %v86_v9  ;;  %p1366_p5 = por %p1365_p4, %p1364_p3 }
  0x2f   :  { %v187_v48 = vand.u32 4294901760, %v1518_v39  ;;  %v119_v50 = vand.u32 4294901760, %v1526_v43  ;;  %v122_v51 = vand.u32 4294901760, %v1528_v44  ;;  %v1548_v52 = vsub.f32 %v59_v33, %v1520_v40 }
  0x30   :  { %1115 = vmatpush3.bf16.msra.mxu1 %v1453_v13  ;;  %1211 = vmatpush3.bf16.msra.mxu0 %v1453_v13  ;;  %v160_v30 = vsub.f32 %v1480_v23, %v159_v24  ;;  %v1556_v53 = vpack.c.bf16 %v116_v42, %v113_v41  ;;  %v194_v54 = vand.u32 4294901760, %v1530_v45  ;;  %v1562_v55 = vsub.f32 %v1444_v7, %v89_v11  ;;  %p1367_p6 = pnand %p1366_p5, %p1360_p2 }
  0x31   :  { %1117 = vmatprep.subr.bf16.mxu1 %v1471_v18  ;;  %1213 = vmatprep.subr.bf16.mxu0 %v1471_v18  ;;  %v181_v56 = vsub.f32 %v1516_v38, %v180_v47  ;;  %v188_v57 = vsub.f32 %v1518_v39, %v187_v48  ;;  %v201_v58 = vand.u32 4294901760, %v1543_v49  ;;  %v1572_v59 = vsub.f32 %v1446_v8, %v92_v12 }
  0x32   :  { %1035 = vmatprep.mubr.f32.mxu0 %v159_v24  ;;  %v161_v32 = vand.u32 4294901760, %v160_v30  ;;  %v1578_v60 = vpack.c.bf16 %v122_v51, %v119_v50  ;;  %v169_v61 = vand.u32 4294901760, %v1548_v52  ;;  %v195_v62 = vsub.f32 %v1530_v45, %v194_v54 }
  0x33   :  { %v208_v63 = vand.u32 4294901760, %v1562_v55  ;;  %v1588_v0 = vsub.f32 %v1455_v14, %v95_v19  ;;  %v1593_v1 = vsub.f32 %v1457_v15, %v98_v20  ;;  %v182_v2 = vand.u32 4294901760, %v181_v56 }
  0x34   :  { %1119 = vmatpush3.bf16.msra.mxu1 %v1471_v18  ;;  %1215 = vmatpush3.bf16.msra.mxu0 %v1471_v18  ;;  %v189_v3 = vand.u32 4294901760, %v188_v57  ;;  %v202_v4 = vsub.f32 %v1543_v49, %v201_v58  ;;  %v215_v5 = vand.u32 4294901760, %v1572_v59  ;;  %v1236_v6 = vpack.c.bf16 %v187_v48, %v180_v47 }
  0x35   :  { %1121 = vmatprep.subr.bf16.mxu1 %v1491_v25  ;;  %1217 = vmatprep.subr.bf16.mxu0 %v1491_v25  ;;  %v170_v7 = vsub.f32 %v1548_v52, %v169_v61  ;;  %v1603_v8 = vsub.f32 %v1475_v21, %v101_v26  ;;  %v196_v9 = vand.u32 4294901760, %v195_v62  ;;  %v209_v11 = vsub.f32 %v1562_v55, %v208_v63 }
  0x36   :  { %930 = vmatprep.mubr.f32.mxu1 %v161_v32  ;;  %v222_v12 = vand.u32 4294901760, %v1588_v0  ;;  %v229_v14 = vand.u32 4294901760, %v1593_v1  ;;  %v1140_v15 = vpack.c.bf16 %v189_v3, %v182_v2  ;;  %v203_v16 = vand.u32 4294901760, %v202_v4 }
  0x37   :  { %v216_v19 = vsub.f32 %v1572_v59, %v215_v5  ;;  %v1616_v20 = vsub.f32 %v1477_v22, %v104_v27  ;;  %v171_v21 = vand.u32 4294901760, %v170_v7  ;;  %v1240_v24 = vpack.c.bf16 %v201_v58, %v194_v54 }
  0x38   :  { %1123 = vmatpush3.bf16.msra.mxu1 %v1491_v25  ;;  %1219 = vmatpush3.bf16.msra.mxu0 %v1491_v25  ;;  %v236_v26 = vand.u32 4294901760, %v1603_v8  ;;  %v1622_v30 = vsub.f32 %v1495_v28, %v107_v31  ;;  %v223_v32 = vsub.f32 %v1588_v0, %v222_v12  ;;  %v230_v33 = vsub.f32 %v1593_v1, %v229_v14 }
  0x39   :  { %1125 = vmatprep.subr.bf16.mxu1 %v1509_v34  ;;  %1221 = vmatprep.subr.bf16.mxu0 %v1509_v34  ;;  %v1631_v22 = vsub.f32 %v1497_v29, %v110_v35  ;;  %v1144_v27 = vpack.c.bf16 %v203_v16, %v196_v9  ;;  %v210_v47 = vand.u32 4294901760, %v209_v11  ;;  %v217_v48 = vand.u32 4294901760, %v216_v19 }
  0x3a   :  { %v243_v28 = vand.u32 4294901760, %v1616_v20  ;;  %v1244_v31 = vpack.c.bf16 %v215_v5, %v208_v63  ;;  %v237_v54 = vsub.f32 %v1603_v8, %v236_v26  ;;  %v1638_v56 = vsub.f32 %v1512_v36, %v113_v41 }
  0x3b   :  { %v224_v29 = vand.u32 4294901760, %v223_v32  ;;  %v231_v35 = vand.u32 4294901760, %v230_v33  ;;  %v250_v57 = vand.u32 4294901760, %v1622_v30  ;;  %v257_v58 = vand.u32 4294901760, %v1631_v22 }
  0x3c   :  { %1127 = vmatpush3.bf16.msra.mxu1 %v1509_v34  ;;  %1223 = vmatpush3.bf16.msra.mxu0 %v1509_v34  ;;  %v1148_v62 = vpack.c.bf16 %v217_v48, %v210_v47  ;;  %v1646_v63 = vsub.f32 %v1514_v37, %v116_v42  ;;  %v1248_v36 = vpack.c.bf16 %v229_v14, %v222_v12  ;;  %v238_v41 = vand.u32 4294901760, %v237_v54 }
  0x3d   :  { %1129 = vmatprep.subr.bf16.mxu1 %v1538_v46  ;;  %1225 = vmatprep.subr.bf16.mxu0 %v1538_v46  ;;  %v1152_v2 = vpack.c.bf16 %v231_v35, %v224_v29  ;;  %v251_v3 = vsub.f32 %v1622_v30, %v250_v57  ;;  %v258_v4 = vsub.f32 %v1631_v22, %v257_v58  ;;  %v264_v5 = vand.u32 4294901760, %v1638_v56 }
  0x3e   :  { %v271_v37 = vand.u32 4294901760, %v1646_v63  ;;  %v1657_v42 = vsub.f32 %v1526_v43, %v119_v50  ;;  %v1662_v7 = vsub.f32 %v1528_v44, %v122_v51  ;;  %v1252_v9 = vpack.c.bf16 %v243_v28, %v236_v26 }
  0x3f   :  { %v252_v11 = vand.u32 4294901760, %v251_v3  ;;  %v259_v12 = vand.u32 4294901760, %v258_v4  ;;  %v265_v14 = vsub.f32 %v1638_v56, %v264_v5  ;;  %v1256_v51 = vpack.c.bf16 %v257_v58, %v250_v57 }
  0x40   :  { %1131 = vmatpush3.bf16.msra.mxu1 %v1538_v46  ;;  %1227 = vmatpush3.bf16.msra.mxu0 %v1538_v46  ;;  %v272_v16 = vsub.f32 %v1646_v63, %v271_v37  ;;  %v278_v43 = vand.u32 4294901760, %v1657_v42  ;;  %v285_v50 = vand.u32 4294901760, %v1662_v7  ;;  %v1260_v33 = vpack.c.bf16 %v271_v37, %v264_v5 }
  0x41   :  { %1133 = vmatprep.subr.bf16.mxu1 %v1556_v53  ;;  %1229 = vmatprep.subr.bf16.mxu0 %v1556_v53  ;;  %v1160_v44 = vpack.c.bf16 %v259_v12, %v252_v11  ;;  %v266_v19 = vand.u32 4294901760, %v265_v14  ;;  %v1176_v54 = vpack.c.bf16 %v1543_v49, %v1530_v45 }
  0x42   :  { %v286_v26 = vsub.f32 %v1662_v7, %v285_v50 }
  0x44   :  { %1135 = vmatpush3.bf16.msra.mxu1 %v1556_v53  ;;  %1231 = vmatpush3.bf16.msra.mxu0 %v1556_v53  ;;  %v287_v47 = vand.u32 4294901760, %v286_v26 }
  0x45   :  { %1137 = vmatprep.subr.bf16.mxu1 %v1578_v60  ;;  %1233 = vmatprep.subr.bf16.mxu0 %v1578_v60 }
  0x48   :  { %1139 = vmatpush3.bf16.msra.mxu1 %v1578_v60  ;;  %1235 = vmatpush3.bf16.msra.mxu0 %v1578_v60 }
  0x49   :  { %1141 = vmatprep.subr.bf16.mxu1 %v1140_v15  ;;  %1237 = vmatprep.subr.bf16.mxu0 %v1236_v6 }
  0x4b   :  { %931 = vmatmul.mubr.f32.vlgmr.msra.gmra.mrb[0].mxu1 %v171_v21  ;;  %1036 = vmatmul.mubr.f32.vlgmr.msra.gmra.mrb[0].mxu0 %v169_v61  ;;  %v244_v61 = vsub.f32 %v1616_v20, %v243_v28  ;;  %v273_v21 = vand.u32 4294901760, %v272_v16  ;;  %v1264_v28 = vpack.c.bf16 %v285_v50, %v278_v43 }
  0x4c   :  { %1143 = vmatpush3.bf16.msra.mxu1 %v1140_v15  ;;  %1239 = vmatpush3.bf16.msra.mxu0 %v1236_v6 }
  0x4d   :  { %1145 = vmatprep.subr.bf16.mxu1 %v1144_v27  ;;  %1241 = vmatprep.subr.bf16.mxu0 %v1240_v24  ;;  %v245_v6 = vand.u32 4294901760, %v244_v61  ;;  %v1164_v32 = vpack.c.bf16 %v273_v21, %v266_v19 }
  0x4e   :  { %965 = vmatprep.mubr.f32.mxu1 %v1463_v17  ;;  %1070 = vmatprep.mubr.f32.mxu0 %v1463_v17 }
  0x4f   :  { %v1156_v15 = vpack.c.bf16 %v245_v6, %v238_v41 }
  0x50   :  { %1147 = vmatpush3.bf16.msra.mxu1 %v1144_v27  ;;  %1243 = vmatpush3.bf16.msra.mxu0 %v1240_v24  ;;  %v279_v24 = vsub.f32 %v1657_v42, %v278_v43 }
  0x51   :  { %1149 = vmatprep.subr.bf16.mxu1 %v1148_v62  ;;  %1245 = vmatprep.subr.bf16.mxu0 %v1244_v31 }
  0x52   :  { %v280_v27 = vand.u32 4294901760, %v279_v24 }
  0x54   :  { %1151 = vmatpush3.bf16.msra.mxu1 %v1148_v62  ;;  %1247 = vmatpush3.bf16.msra.mxu0 %v1244_v31  ;;  %v1168_v48 = vpack.c.bf16 %v287_v47, %v280_v27  ;;  %v1172_v31 = vpack.c.bf16 %v1518_v39, %v1516_v38  ;;  %v1180_v38 = vpack.c.bf16 %v1572_v59, %v1562_v55 }
  0x55   :  { %1153 = vmatprep.subr.bf16.mxu1 %v1152_v2  ;;  %1249 = vmatprep.subr.bf16.mxu0 %v1248_v36  ;;  %v1184_v39 = vpack.c.bf16 %v1593_v1, %v1588_v0 }
  0x58   :  { %1155 = vmatpush3.bf16.msra.mxu1 %v1152_v2  ;;  %1251 = vmatpush3.bf16.msra.mxu0 %v1248_v36 }
  0x59   :  { %1157 = vmatprep.subr.bf16.mxu1 %v1156_v15  ;;  %1253 = vmatprep.subr.bf16.mxu0 %v1252_v9 }
  0x5c   :  { %1159 = vmatpush3.bf16.msra.mxu1 %v1156_v15  ;;  %1255 = vmatpush3.bf16.msra.mxu0 %v1252_v9 }
  0x5d   :  { %1161 = vmatprep.subr.bf16.mxu1 %v1160_v44  ;;  %1257 = vmatprep.subr.bf16.mxu0 %v1256_v51 }
  0x60   :  { %1163 = vmatpush3.bf16.msra.mxu1 %v1160_v44  ;;  %1259 = vmatpush3.bf16.msra.mxu0 %v1256_v51 }
  0x61   :  { %1165 = vmatprep.subr.bf16.mxu1 %v1164_v32  ;;  %1261 = vmatprep.subr.bf16.mxu0 %v1260_v33 }
  0x64   :  { %1167 = vmatpush3.bf16.msra.mxu1 %v1164_v32  ;;  %1263 = vmatpush3.bf16.msra.mxu0 %v1260_v33 }
  0x65   :  { %1169 = vmatprep.subr.bf16.mxu1 %v1168_v48  ;;  %1265 = vmatprep.subr.bf16.mxu0 %v1264_v28 }
  0x68   :  { %1171 = vmatpush3.bf16.msra.mxu1 %v1168_v48  ;;  %1267 = vmatpush3.bf16.msra.mxu0 %v1264_v28 }
  0x69   :  { %1173 = vmatprep.subr.bf16.mxu1 %v1172_v31  ;;  %1269 = vmatprep.subr.bf16.mxu0 %v1449_v10 }
  0x6b   :  { %966 = vmatmul.mubr.f32.vlgmr.msra.gmra.mrb[0].mxu1 %v1520_v40  ;;  %1071 = vmatmul.mubr.f32.vlgmr.msra.gmra.mrb[0].mxu0 %v1520_v40 }
  0x6c   :  { %1175 = vmatpush3.bf16.msra.mxu1 %v1172_v31  ;;  %1271 = vmatpush3.bf16.msra.mxu0 %v1449_v10  ;;  %v1188_v10 = vpack.c.bf16 %v1616_v20, %v1603_v8 }
  0x6d   :  { %1177 = vmatprep.subr.bf16.mxu1 %v1176_v54  ;;  %1273 = vmatprep.subr.bf16.mxu0 %v1453_v13 }
  0x6e   :  { %1000 = vmatprep.mubr.f32.mxu1 %v1480_v23  ;;  %1105 = vmatprep.mubr.f32.mxu0 %v1463_v17  ;;  %v1196_v17 = vpack.c.bf16 %v1646_v63, %v1638_v56 }
  0x70   :  { %1179 = vmatpush3.bf16.msra.mxu1 %v1176_v54  ;;  %1275 = vmatpush3.bf16.msra.mxu0 %v1453_v13  ;;  %v1192_v13 = vpack.c.bf16 %v1631_v22, %v1622_v30 }
  0x71   :  { %1181 = vmatprep.subr.bf16.mxu1 %v1180_v38  ;;  %1277 = vmatprep.subr.bf16.mxu0 %v1471_v18 }
  0x74   :  { %1183 = vmatpush3.bf16.msra.mxu1 %v1180_v38  ;;  %1279 = vmatpush3.bf16.msra.mxu0 %v1471_v18  ;;  %v1200_v18 = vpack.c.bf16 %v1662_v7, %v1657_v42 }
  0x75   :  { %1185 = vmatprep.subr.bf16.mxu1 %v1184_v39  ;;  %1281 = vmatprep.subr.bf16.mxu0 %v1491_v25 }
  0x78   :  { %1187 = vmatpush3.bf16.msra.mxu1 %v1184_v39  ;;  %1283 = vmatpush3.bf16.msra.mxu0 %v1491_v25  ;;  %v789_v25 = vld [vmem:[%s1728_s2] ss:$0 sm:$0xff] }
  0x79   :  { %1189 = vmatprep.subr.bf16.mxu1 %v1188_v10  ;;  %1285 = vmatprep.subr.bf16.mxu0 %v1509_v34 }
  0x7c   :  { %1191 = vmatpush3.bf16.msra.mxu1 %v1188_v10  ;;  %1287 = vmatpush3.bf16.msra.mxu0 %v1509_v34 }
  0x7d   :  { %1193 = vmatprep.subr.bf16.mxu1 %v1192_v13  ;;  %1289 = vmatprep.subr.bf16.mxu0 %v1538_v46 }
  0x80   :  { %1195 = vmatpush3.bf16.msra.mxu1 %v1192_v13  ;;  %1291 = vmatpush3.bf16.msra.mxu0 %v1538_v46 }
  0x81   :  { %1197 = vmatprep.subr.bf16.mxu1 %v1196_v17  ;;  %1293 = vmatprep.subr.bf16.mxu0 %v1556_v53 }
  0x84   :  { %1199 = vmatpush3.bf16.msra.mxu1 %v1196_v17  ;;  %1295 = vmatpush3.bf16.msra.mxu0 %v1556_v53 }
  0x85   :  { %1201 = vmatprep.subr.bf16.mxu1 %v1200_v18  ;;  %1297 = vmatprep.subr.bf16.mxu0 %v1578_v60 }
  0x88   :  { %1203 = vmatpush3.bf16.msra.mxu1 %v1200_v18  ;;  %1299 = vmatpush3.bf16.msra.mxu0 %v1578_v60 }
  0x8b   :  { %1001 = vmatmul.mubr.f32.vlgmr.msra.gmra.mrb[0].mxu1 %v1548_v52  ;;  %1106 = vmatmul.mubr.f32.vlgmr.msra.gmra.mrb[0].mxu0 %v1520_v40 }
 0x15e   :  { %v1002_v23 = vpop.f32.mrb[0].mxu1  ;;  %v1107_v34 = vpop.f32.mrb[0].mxu0 }
 0x15f   :  { %v1300_v45 = vadd.f32 %v1107_v34, %v1002_v23  ;;  %v434_v46 = vpop.f32.mrb[1].mxu1  ;;  %v750_v49 = vpop.f32.mrb[1].mxu0 }
 0x160   :  { %v1301_v53 = vadd.f32 %v750_v49, %v434_v46 }
 0x161   :  { %v761_v55 = vadd.f32 %v1300_v45, %v789_v25 }
 0x162   :  { %v760_v59 = vadd.f32 %v1301_v53, %v789_v25 }
 0x163   :  { %770 = vst [vmem:[#allocation8 + $0x8] sm:$0xff] %v761_v55 }
 0x164   :  { %769 = vst [vmem:[#allocation8] sm:$0xff] %v760_v59 }
 0x165   :  { %1370 = shalt.err (!%p1367_p6)
}
 0x166   :  { %s1371_s15 = scalar_lea.hbm %s1729_s3, 256 }
 0x167   :  { %p1372_p7 = scmp.ne.s32.totalorder %s1729_s3, %s1371_s15  ;;  %p1375_p8 = scmp.lt.u32.totalorder %s1371_s15, %s1729_s3 }
 0x169   :  { %p1377_p9 = pnand %p1375_p8, %p1372_p7 }
 0x16b   :  { %1380 = shalt.err (!%p1377_p9)
}
 0x16c   :  { %782 = dma.vmem_to_hbm [thread:$0]  %s777_s12, 256, %s1729_s3, [#allocation5], %s1388_s22, %s1388_s22, %s1389_s23  }
 0x16d   :  { %1385 = dma.done.wait [#allocation5], 256  }
 0x16e   :  { %1386 = vsyncadd [#allocation5], 4294967040 }
 0x16f   :  { %786 = vsyncpa [#allocation4], 1 }
 0x170   :  { %787 = vsyncpa [#allocation7], 1 }
 0x171   :  { %788 = vsyncpa [#allocation5], 1 }

</bundles_post_ra>
